<compile_context>
chip_gen: v6e
topology: v6e:2x2x1
jax: 0.10.0
libtpu: 0.0.40
codegen_flags: <defaults>
</compile_context>

<pallas_src>
import functools

import jax
import jax.numpy as jnp
from jax.experimental import pallas as pl
from jax.experimental.pallas import tpu as pltpu


# ----------------------------------------------------------------------------
# Fused kernel: per image b (grid = (B,)):
#   conv row-matmul -> ReLU -> height-mean -> decoder matmul -> log-softmax
#   -> per-token NLL + argmax.
# ----------------------------------------------------------------------------
def _fused_kernel(p_ref, cw_ref, cb_ref, dw_ref, db_ref, tgt_ref,
                  pred_ref, nll_ref, *, h, w):
    # p_ref   : (H*W, 9*Cin) bf16   im2col patches of image b
    # cw_ref  : (9*Cin, E)   bf16   conv weights (tap-major, Cin inner)
    # cb_ref  : (1, E)       f32    conv bias
    # dw_ref  : (E, Vp)      bf16   decoder weight, vocab padded to 128 lanes
    # db_ref  : (1, Vp)      f32    decoder bias (-1e30 on padded columns)
    # tgt_ref : (W, 1)       int32  target token ids for image b
    # pred_ref: (W, 1)       int32  argmax predictions
    # nll_ref : (W, 1)       f32    per-token negative log-likelihood

    # ---- Encoder: one bf16 matmul (f32 accumulate), ReLU, mean over H. -----
    conv = jnp.dot(p_ref[...], cw_ref[...],
                   preferred_element_type=jnp.float32) + cb_ref[...]
    conv = jnp.maximum(conv, 0.0)                        # (H*W, E) f32
    e = conv.shape[-1]
    feat = jnp.sum(conv.reshape(h, w, e), axis=0) * (1.0 / h)   # (W, E) f32

    # ---- Decoder: bf16 matmul + f32 bias; log-softmax/NLL/argmax in f32. ---
    logits = jnp.dot(feat.astype(jnp.bfloat16), dw_ref[...],
                     preferred_element_type=jnp.float32) + db_ref[...]
    m = jnp.max(logits, axis=-1, keepdims=True)          # (W, 1)
    z = logits - m
    lse = jnp.log(jnp.sum(jnp.exp(z), axis=-1, keepdims=True))
    logp = z - lse                                       # (W, Vp), vreg-only

    vp = logits.shape[-1]
    col = jax.lax.broadcasted_iota(jnp.int32, logits.shape, 1)

    # argmax: first index achieving the row max (matches torch.argmax).
    is_max = logits == m
    pred_ref[...] = jnp.min(jnp.where(is_max, col, vp), axis=-1,
                            keepdims=True).astype(jnp.int32)

    # NLL of the target token, selected with an iota mask (no one-hot buffer).
    tgt_lp = jnp.where(col == tgt_ref[...], logp, 0.0)
    nll_ref[...] = -jnp.sum(tgt_lp, axis=-1, keepdims=True)


# ----------------------------------------------------------------------------
# Wrapper
# ----------------------------------------------------------------------------
@jax.jit
def model_forward(images, labels, conv_w, conv_b, dec_w, dec_b):
    """Mirrors model.forward for encoder='cnn', decoder='linear'.

    images: (B, Cin, H, W) float32 (NCHW, PyTorch convention)
    labels: (B, L) int32 with L = W + 1 (first token is a start token)
    Returns (predictions (B, W) int32, total_loss scalar f32, accuracy f32).
    """
    B, Cin, H, W = images.shape
    E = conv_w.shape[-1]
    V = dec_w.shape[-1]
    C9 = 9 * Cin
    HW = H * W

    # NHWC layout + "same" pad + im2col, fused by XLA under this jit and
    # materialized in bf16 (halves the im2col HBM bytes).
    x = jnp.transpose(images, (0, 2, 3, 1))                   # (B, H, W, Cin)
    xp = jnp.pad(x, ((0, 0), (1, 1), (1, 1), (0, 0)))
    taps = [xp[:, kh:kh + H, kw:kw + W, :]
            for kh in range(3) for kw in range(3)]
    patches = jnp.concatenate(taps, axis=-1).reshape(B, HW, C9)
    patches = patches.astype(jnp.bfloat16)                    # (B, H*W, 9*Cin)

    cw = conv_w.reshape(C9, E).astype(jnp.bfloat16)
    cb = conv_b.reshape(1, E).astype(jnp.float32)

    # Pad vocab to a lane-dense multiple of 128; padded logits are forced to
    # -1e30 via the f32 bias so softmax / argmax / loss are unaffected.
    Vp = ((V + 127) // 128) * 128
    dwp = jnp.zeros((E, Vp), jnp.bfloat16).at[:, :V].set(
        dec_w.astype(jnp.bfloat16))
    dbp = jnp.full((1, Vp), -1e30, jnp.float32).at[:, :V].set(
        dec_b.reshape(1, V).astype(jnp.float32))

    # labels_tgt = labels.permute(1,0); criterion(out.permute(1,2,0), labels_tgt[1:])
    # == mean over (b, s) of -log_softmax(logits)[b, s, labels[b, s+1]]
    targets = labels[:, 1:].astype(jnp.int32)                 # (B, W)
    tgt3 = targets.reshape(B, W, 1)

    kernel = functools.partial(_fused_kernel, h=H, w=W)
    preds, nll = pl.pallas_call(
        kernel,
        out_shape=(jax.ShapeDtypeStruct((B, W, 1), jnp.int32),
                   jax.ShapeDtypeStruct((B, W, 1), jnp.float32)),
        grid=(B,),
        in_specs=[
            pl.BlockSpec((None, HW, C9), lambda b: (b, 0, 0)),
            pl.BlockSpec((C9, E), lambda b: (0, 0)),
            pl.BlockSpec((1, E), lambda b: (0, 0)),
            pl.BlockSpec((E, Vp), lambda b: (0, 0)),
            pl.BlockSpec((1, Vp), lambda b: (0, 0)),
            pl.BlockSpec((None, W, 1), lambda b: (b, 0, 0)),
        ],
        out_specs=(
            pl.BlockSpec((None, W, 1), lambda b: (b, 0, 0)),
            pl.BlockSpec((None, W, 1), lambda b: (b, 0, 0)),
        ),
        compiler_params=pltpu.CompilerParams(
            dimension_semantics=("parallel",),
            vmem_limit_bytes=32 * 1024 * 1024),
    )(patches, cw, cb, dwp, dbp, tgt3)

    total_loss = jnp.mean(nll)                                # CE, reduction='mean'
    predictions = preds.reshape(B, W)

    # TODO(synk): get_accuracy() is not defined in the reference source
    # (stops at the _END_ token); use plain token accuracy instead.
    accuracy = jnp.mean((predictions == targets).astype(jnp.float32))
    return predictions, total_loss, accuracy


# ----------------------------------------------------------------------------
# Main
# ----------------------------------------------------------------------------
if __name__ == "__main__":
    # Small config consistent with the module's forward.
    B, Cin, H, W = 2, 1, 8, 16       # images
    E = 32                           # encoder_emb
    V = 16                           # vocab size
    L = W + 1                        # label length (seq = image width)

    key = jax.random.PRNGKey(0)
    k_img, k_lab, k_cw, k_cb, k_dw, k_db = jax.random.split(key, 6)

    images = jax.random.normal(k_img, (B, Cin, H, W), dtype=jnp.float32)
    labels = jax.random.randint(k_lab, (B, L), 0, V, dtype=jnp.int32)

    # Deterministic parameter init (fan-in scaled normals).
    conv_w = (jax.random.normal(k_cw, (9, Cin, E), dtype=jnp.float32)
              / jnp.sqrt(9.0 * Cin))
    conv_b = jax.random.normal(k_cb, (E,), dtype=jnp.float32) * 0.01
    dec_w = jax.random.normal(k_dw, (E, V), dtype=jnp.float32) / jnp.sqrt(float(E))
    dec_b = jax.random.normal(k_db, (V,), dtype=jnp.float32) * 0.01

    preds, loss, acc = model_forward(images, labels, conv_w, conv_b,
                                     dec_w, dec_b)
    jax.block_until_ready((preds, loss, acc))

    assert preds.shape == (B, W)
    assert preds.dtype == jnp.int32
    assert loss.shape == ()
    assert jnp.isfinite(loss)
    assert bool(jnp.all(preds >= 0)) and bool(jnp.all(preds < V))
    assert acc.shape == ()
    print("KERNEL_OK")
</pallas_src>

<mosaic_0001>
module attributes {stable_mosaic.version = 11 : i64} {
  func.func @_fused_kernel(%arg0: i32, %arg1: memref<1x128x9xbf16, #tpu.memory_space<vmem>>, %arg2: memref<9x32xbf16, #tpu.memory_space<vmem>>, %arg3: memref<1x32xf32, #tpu.memory_space<vmem>>, %arg4: memref<32x128xbf16, #tpu.memory_space<vmem>>, %arg5: memref<1x128xf32, #tpu.memory_space<vmem>>, %arg6: memref<1x16x1xi32, #tpu.memory_space<vmem>>, %arg7: memref<1x16x1xi32, #tpu.memory_space<vmem>>, %arg8: memref<1x16x1xf32, #tpu.memory_space<vmem>>) attributes {dimension_semantics = [#tpu.dimension_semantics<parallel>], iteration_bounds = array<i64: 2>, scalar_prefetch = 0 : i64, scratch_operands = 0 : i64, tpu.core_type = #tpu.core_type<tc>, window_params = [{transform_indices = @transform_0, window_bounds = array<i64: 1, 128, 9>}, {pipeline_mode = #tpu.pipeline_mode<synchronous>, transform_indices = @transform_1, window_bounds = array<i64: 9, 32>}, {pipeline_mode = #tpu.pipeline_mode<synchronous>, transform_indices = @transform_2, window_bounds = array<i64: 1, 32>}, {pipeline_mode = #tpu.pipeline_mode<synchronous>, transform_indices = @transform_3, window_bounds = array<i64: 32, 128>}, {pipeline_mode = #tpu.pipeline_mode<synchronous>, transform_indices = @transform_4, window_bounds = array<i64: 1, 128>}, {transform_indices = @transform_5, window_bounds = array<i64: 1, 16, 1>}, {transform_indices = @transform_6, window_bounds = array<i64: 1, 16, 1>}, {transform_indices = @transform_7, window_bounds = array<i64: 1, 16, 1>}]} {
    %c0 = arith.constant 0 : index
    %c0_0 = arith.constant 0 : index
    %c0_1 = arith.constant 0 : index
    %0 = vector.load %arg1[%c0, %c0_0, %c0_1] : memref<1x128x9xbf16, #tpu.memory_space<vmem>>, vector<1x128x9xbf16>
    %1 = vector.shape_cast %0 : vector<1x128x9xbf16> to vector<128x9xbf16>
    %c0_2 = arith.constant 0 : index
    %c0_3 = arith.constant 0 : index
    %2 = vector.load %arg2[%c0_2, %c0_3] : memref<9x32xbf16, #tpu.memory_space<vmem>>, vector<9x32xbf16>
    %cst = arith.constant dense<0.000000e+00> : vector<128x32xf32>
    %3 = tpu.matmul %1, %2, %cst {dimension_numbers = #tpu.dot_dimension_numbers<[1], [0], [0], [1], [0, 0, 1, 1], [], []>} : vector<128x9xbf16>, vector<9x32xbf16>, vector<128x32xf32> -> vector<128x32xf32>
    %c0_4 = arith.constant 0 : index
    %c0_5 = arith.constant 0 : index
    %4 = vector.load %arg3[%c0_4, %c0_5] : memref<1x32xf32, #tpu.memory_space<vmem>>, vector<1x32xf32>
    %5 = vector.broadcast %4 : vector<1x32xf32> to vector<128x32xf32>
    %6 = arith.addf %3, %5 : vector<128x32xf32>
    %cst_6 = arith.constant 0.000000e+00 : f32
    %7 = vector.broadcast %cst_6 : f32 to vector<128x32xf32>
    %8 = arith.maximumf %6, %7 : vector<128x32xf32>
    %9 = vector.shape_cast %8 : vector<128x32xf32> to vector<8x16x32xf32>
    %cst_7 = arith.constant dense<0.000000e+00> : vector<16x32xf32>
    %10 = vector.multi_reduction <add>, %9, %cst_7 [0] : vector<8x16x32xf32> to vector<16x32xf32>
    %cst_8 = arith.constant 1.250000e-01 : f32
    %11 = vector.broadcast %cst_8 : f32 to vector<16x32xf32>
    %12 = arith.mulf %10, %11 : vector<16x32xf32>
    %13 = arith.truncf %12 : vector<16x32xf32> to vector<16x32xbf16>
    %c0_9 = arith.constant 0 : index
    %c0_10 = arith.constant 0 : index
    %14 = vector.load %arg4[%c0_9, %c0_10] : memref<32x128xbf16, #tpu.memory_space<vmem>>, vector<32x128xbf16>
    %cst_11 = arith.constant dense<0.000000e+00> : vector<16x128xf32>
    %15 = tpu.matmul %13, %14, %cst_11 {dimension_numbers = #tpu.dot_dimension_numbers<[1], [0], [0], [1], [0, 0, 1, 1], [], []>} : vector<16x32xbf16>, vector<32x128xbf16>, vector<16x128xf32> -> vector<16x128xf32>
    %c0_12 = arith.constant 0 : index
    %c0_13 = arith.constant 0 : index
    %16 = vector.load %arg5[%c0_12, %c0_13] : memref<1x128xf32, #tpu.memory_space<vmem>>, vector<1x128xf32>
    %17 = vector.broadcast %16 : vector<1x128xf32> to vector<16x128xf32>
    %18 = arith.addf %15, %17 : vector<16x128xf32>
    %cst_14 = arith.constant dense<0xFF800000> : vector<16xf32>
    %19 = vector.multi_reduction <maximumf>, %18, %cst_14 [1] : vector<16x128xf32> to vector<16xf32>
    %20 = vector.shape_cast %19 : vector<16xf32> to vector<16x1xf32>
    %21 = vector.broadcast %20 : vector<16x1xf32> to vector<16x128xf32>
    %22 = arith.subf %18, %21 : vector<16x128xf32>
    %23 = math.exp %22 : vector<16x128xf32>
    %cst_15 = arith.constant dense<0.000000e+00> : vector<16xf32>
    %24 = vector.multi_reduction <add>, %23, %cst_15 [1] : vector<16x128xf32> to vector<16xf32>
    %25 = vector.shape_cast %24 : vector<16xf32> to vector<16x1xf32>
    %26 = math.log %25 : vector<16x1xf32>
    %27 = vector.broadcast %26 : vector<16x1xf32> to vector<16x128xf32>
    %28 = arith.subf %22, %27 : vector<16x128xf32>
    %29 = tpu.iota {dimensions = array<i32: 1>} : vector<16x128xi32>
    %30 = vector.broadcast %20 : vector<16x1xf32> to vector<16x128xf32>
    %31 = arith.cmpf oeq, %18, %30 : vector<16x128xf32>
    %c128_i32 = arith.constant 128 : i32
    %32 = vector.broadcast %c128_i32 : i32 to vector<16x128xi32>
    %33 = arith.select %31, %29, %32 : vector<16x128xi1>, vector<16x128xi32>
    %cst_16 = arith.constant dense<2147483647> : vector<16xi32>
    %34 = vector.multi_reduction <minsi>, %33, %cst_16 [1] : vector<16x128xi32> to vector<16xi32>
    %35 = vector.shape_cast %34 : vector<16xi32> to vector<16x1xi32>
    %c0_17 = arith.constant 0 : index
    %c0_18 = arith.constant 0 : index
    %c0_19 = arith.constant 0 : index
    %36 = vector.load %arg7[%c0_17, %c0_18, %c0_19] : memref<1x16x1xi32, #tpu.memory_space<vmem>>, vector<1x16x1xi32>
    %37 = vector.shape_cast %36 : vector<1x16x1xi32> to vector<16x1xi32>
    %38 = vector.shape_cast %35 : vector<16x1xi32> to vector<1x16x1xi32>
    tpu.vector_store %arg7[%c0_17, %c0_18, %c0_19], %38 {strides = array<i32>} : memref<1x16x1xi32, #tpu.memory_space<vmem>>, vector<1x16x1xi32>,
    %c0_20 = arith.constant 0 : index
    %c0_21 = arith.constant 0 : index
    %c0_22 = arith.constant 0 : index
    %39 = vector.load %arg6[%c0_20, %c0_21, %c0_22] : memref<1x16x1xi32, #tpu.memory_space<vmem>>, vector<1x16x1xi32>
    %40 = vector.shape_cast %39 : vector<1x16x1xi32> to vector<16x1xi32>
    %41 = vector.broadcast %40 : vector<16x1xi32> to vector<16x128xi32>
    %42 = arith.cmpi eq, %29, %41 : vector<16x128xi32>
    %cst_23 = arith.constant 0.000000e+00 : f32
    %43 = vector.broadcast %cst_23 : f32 to vector<16x128xf32>
    %44 = arith.select %42, %28, %43 : vector<16x128xi1>, vector<16x128xf32>
    %cst_24 = arith.constant dense<0.000000e+00> : vector<16xf32>
    %45 = vector.multi_reduction <add>, %44, %cst_24 [1] : vector<16x128xf32> to vector<16xf32>
    %46 = vector.shape_cast %45 : vector<16xf32> to vector<16x1xf32>
    %cst_25 = arith.constant 0.000000e+00 : f32
    %47 = vector.broadcast %cst_25 : f32 to vector<16x1xf32>
    %48 = arith.subf %47, %46 : vector<16x1xf32>
    %c0_26 = arith.constant 0 : index
    %c0_27 = arith.constant 0 : index
    %c0_28 = arith.constant 0 : index
    %49 = vector.load %arg8[%c0_26, %c0_27, %c0_28] : memref<1x16x1xf32, #tpu.memory_space<vmem>>, vector<1x16x1xf32>
    %50 = vector.shape_cast %49 : vector<1x16x1xf32> to vector<16x1xf32>
    %51 = vector.shape_cast %48 : vector<16x1xf32> to vector<1x16x1xf32>
    tpu.vector_store %arg8[%c0_26, %c0_27, %c0_28], %51 {strides = array<i32>} : memref<1x16x1xf32, #tpu.memory_space<vmem>>, vector<1x16x1xf32>,
    return
  }
  func.func @transform_0(%arg0: i32) -> (i32, i32, i32) {
    %c0_i32 = arith.constant 0 : i32
    %c0_i32_0 = arith.constant 0 : i32
    %c0_i32_1 = arith.constant 0 : i32
    return %arg0, %c0_i32, %c0_i32_0 : i32, i32, i32
  }
  func.func @transform_1(%arg0: i32) -> (i32, i32) {
    %c0_i32 = arith.constant 0 : i32
    %c0_i32_0 = arith.constant 0 : i32
    %c0_i32_1 = arith.constant 0 : i32
    return %c0_i32, %c0_i32_0 : i32, i32
  }
  func.func @transform_2(%arg0: i32) -> (i32, i32) {
    %c0_i32 = arith.constant 0 : i32
    %c0_i32_0 = arith.constant 0 : i32
    %c0_i32_1 = arith.constant 0 : i32
    return %c0_i32, %c0_i32_0 : i32, i32
  }
  func.func @transform_3(%arg0: i32) -> (i32, i32) {
    %c0_i32 = arith.constant 0 : i32
    %c0_i32_0 = arith.constant 0 : i32
    %c0_i32_1 = arith.constant 0 : i32
    return %c0_i32, %c0_i32_0 : i32, i32
  }
  func.func @transform_4(%arg0: i32) -> (i32, i32) {
    %c0_i32 = arith.constant 0 : i32
    %c0_i32_0 = arith.constant 0 : i32
    %c0_i32_1 = arith.constant 0 : i32
    return %c0_i32, %c0_i32_0 : i32, i32
  }
  func.func @transform_5(%arg0: i32) -> (i32, i32, i32) {
    %c0_i32 = arith.constant 0 : i32
    %c0_i32_0 = arith.constant 0 : i32
    %c0_i32_1 = arith.constant 0 : i32
    return %arg0, %c0_i32, %c0_i32_0 : i32, i32, i32
  }
  func.func @transform_6(%arg0: i32) -> (i32, i32, i32) {
    %c0_i32 = arith.constant 0 : i32
    %c0_i32_0 = arith.constant 0 : i32
    %c0_i32_1 = arith.constant 0 : i32
    return %arg0, %c0_i32, %c0_i32_0 : i32, i32, i32
  }
  func.func @transform_7(%arg0: i32) -> (i32, i32, i32) {
    %c0_i32 = arith.constant 0 : i32
    %c0_i32_0 = arith.constant 0 : i32
    %c0_i32_1 = arith.constant 0 : i32
    return %arg0, %c0_i32, %c0_i32_0 : i32, i32, i32
  }
}

</mosaic_0001>

<bundles_post_ra>
// kernel: model_forward.1
= control target key start
LH: loop header
LB: loop body
LE: loop exit
PB: predicated region body
PF: predicated region fallthrough
CT: control target
= control target key end

     0   :  { %s972_s24 = smov 0   ;;  %s1044_s0 = inlined_call_operand.vmem [shape: bf16[2,128,9], index: 0, kind: input, shape index: {}]   ;;  %s1045_s1 = inlined_call_operand.vmem [shape: bf16[9,32], index: 1, kind: input, shape index: {}]   ;;  %s1046_s2 = inlined_call_operand.vmem [shape: f32[1,32], index: 2, kind: input, shape index: {}]   ;;  %s1047_s3 = inlined_call_operand.vmem [shape: bf16[32,128], index: 3, kind: input, shape index: {}]   ;;  %s1048_s4 = inlined_call_operand.vmem [shape: f32[1,128], index: 4, kind: input, shape index: {}]   ;;  %s1049_s5 = inlined_call_operand.vmem [shape: s32[2,16,1], index: 5, kind: input, shape index: {}]   ;;  %s1050_s6 = inlined_call_operand.vmem [shape: s32[2,16,1], index: 6, kind: output, shape index: {0}]   ;;  %s1051_s7 = inlined_call_operand.vmem [shape: f32[2,16,1], index: 7, kind: output, shape index: {1}]  }
   0x1 LB: > { %s806_s25 = sadd.s32 4294967295, %s926_s24   ;;  %p810_p0 = scmp.ge.s32.totalorder %s926_s24, 1  ;;  %s926_s24 = sphi %s972_s24, %s18_s24  }
   0x2   : > { %p250_p1 = scmp.lt.s32.totalorder %s926_s24, 3 }
   0x4   : > { %p251_p2 = pnand %p810_p0, %p250_p1 }
   0x5   : > { %p292_p3 = scmp.lt.s32.totalorder (!%p251_p2), %s806_s25, 1 }
   0x6   : > { %254 = sbr.rel (%p251_p2) target bundleno = 905 (0x389), region = 44 }
   0xb   : > { %v901_v0 = vld [vmem:[%s1045_s1] sm:$0x1f]   ;;  %vm408_vm0 = vcmask 1043456   ;;  %vm409_vm1 = vcmask 1044480   ;;  %v928_v1 = vmov 65535   ;;  %s1053_s25 = smov (!%p292_p3, %s806_s25), 1 }
   0xc   : > { %v410_v2 = vsel %vm408_vm0, 4294967295, %v928_v1  ;;  %s843_s28 = sshll.u32 %s1053_s25, 6  ;;  %vm383_vm2 = vcmask 72704   ;;  %v910_v13 = vld [vmem:[%s1047_s3 + $0x8] sm:$0xff]   ;;  %v929_v14 = vmov 0.0   ;;  %v911_v15 = vld [vmem:[%s1047_s3] sm:$0xff]  }
   0xd   : > { %v411_v3 = vsel %vm409_vm1, %v410_v2, 0  ;;  %s296_s8 = scalar_lea.vmem %s1044_s0, %s843_s28  ;;  %vm930_vm3 = vmmov 0   ;;  %v819_v18 = vld [vmem:[%s1046_s2] ss:$0 sm:$0xff]  ;;  %vm528_vm4 = vcmask 261120   ;;  %s1027_s17 = sshll.u32 %s1053_s25, 4 }
   0xe   : > { %v413_v4 = vand.u32 %v901_v0, %v411_v3  ;;  %v902_v5 = vld [vmem:[%s296_s8] sm:$0xff]   ;;  %v903_v6 = vld [vmem:[%s296_s8 + $0x8] sm:$0xff]   ;;  %v904_v7 = vld [vmem:[%s296_s8 + $0x10] sm:$0xff]   ;;  %s301_s20 = scalar_lea.vmem %s1049_s5, %s1027_s17  ;;  %s306_s23 = scalar_lea.vmem %s1050_s6, %s1027_s17  ;;  %vm683_vm11 = vcmask 7168  }
   0xf   : > { %861 = vmatprep.mubr.msk.bf16.mxu0 %vm383_vm2, %v902_v5  ;;  %v906_v8 = vld [vmem:[%s296_s8 + $0x30] sm:$0xff]   ;;  %v907_v9 = vld [vmem:[%s296_s8 + $0x38] sm:$0xff]   ;;  %v908_v11 = vld [vmem:[%s296_s8 + $0x20] sm:$0xff]   ;;  %s311_s27 = scalar_lea.vmem %s1051_s7, %s1027_s17 }
  0x10   : > { %859 = vmatprep.subr.bf16.mxu0 %v413_v4  ;;  %885 = vmatprep.subr.bf16.mxu1 %v413_v4  ;;  %v905_v10 = vld [vmem:[%s296_s8 + $0x18] sm:$0xff]   ;;  %v909_v12 = vld [vmem:[%s296_s8 + $0x28] sm:$0xff]  }
  0x11   : > { %860 = vmatpush3.bf16.msra.mxu0 %v413_v4  ;;  %886 = vmatpush3.bf16.msra.mxu1 %v413_v4 }
  0x12   : > { %873 = vmatprep.mubr.msk.bf16.mxu1 %vm383_vm2, %v906_v8  ;;  %877 = vmatprep.subr.bf16.mxu1 %v929_v14 }
  0x14   : > { %862 = vmatmul.mubr.msk.bf16.vlgmr.msra.gmra.mxu0 %vm383_vm2, %v903_v6  ;;  %874 = vmatmul.mubr.msk.bf16.vlgmr.msra.gmra.mxu1 %vm383_vm2, %v907_v9 }
  0x15   : > { %865 = vmatprep.mubr.msk.bf16.mxu0 %vm383_vm2, %v904_v7  ;;  %878 = vmatpush3.bf16.msra.mxu1 %v910_v13 }
  0x16   : > { %879 = vmatprep.subr.bf16.mxu1 %v929_v14  ;;  %881 = vmatprep.mubr.msk.bf16.mxu1 %vm930_vm3, %v929_v14 }
  0x19   : > { %880 = vmatpush3.bf16.msra.mxu1 %v911_v15 }
  0x1c   : > { %866 = vmatmul.mubr.msk.bf16.gmra.mxu0 %vm383_vm2, %v905_v10 }
  0x1d   : > { %869 = vmatprep.mubr.msk.bf16.mxu0 %vm383_vm2, %v908_v11 }
  0x24   : > { %870 = vmatmul.mubr.msk.bf16.gmra.mxu0 %vm383_vm2, %v909_v12 }
  0xd4   : > { %v863_v16 = vpop.f32.mrf.mxu0  ;;  %v875_v24 = vpop.f32.mrf.mxu1 }
  0xd5   : > { %v458_v22 = vadd.f32 %v863_v16, %v819_v18  ;;  %v506_v1 = vadd.f32 %v875_v24, %v819_v18 }
  0xd6   : > { %v449_v17 = vpop.f32.mrf.mxu0  ;;  %v497_v33 = vpop.f32.mrf.mxu1 }
  0xd7   : > { %v450_v20 = vadd.f32 %v819_v18, %v449_v17  ;;  %v514_v28 = vmax.f32 %v458_v22, 0.0  ;;  %v498_v54 = vadd.f32 %v819_v18, %v497_v33  ;;  %v526_v16 = vmax.f32 %v506_v1, 0.0 }
  0xd8   : > { %v864_v19 = vpop.f32.mrf.mxu0  ;;  %v876_v45 = vpop.f32.mrf.mxu1 }
  0xd9   : > { %v512_v25 = vmax.f32 %v450_v20, 0.0  ;;  %v461_v29 = vadd.f32 %v864_v19, %v819_v18  ;;  %v530_v38 = vsel %vm528_vm4, %v514_v28, 0.0  ;;  %v524_v4 = vmax.f32 %v498_v54, 0.0 }
  0xda   : > { %v452_v21 = vpop.f32.mrf.mxu0  ;;  %v500_v59 = vpop.f32.mrf.mxu1  ;;  %v509_v9 = vadd.f32 %v876_v45, %v819_v18 }
  0xdb   : > { %v453_v26 = vadd.f32 %v819_v18, %v452_v21  ;;  %v529_v34 = vsel %vm528_vm4, %v512_v25, 0.0  ;;  %v515_v39 = vmax.f32 %v461_v29, 0.0  ;;  %v501_v6 = vadd.f32 %v819_v18, %v500_v59  ;;  %v687_v59 = vld [vmem:[%s301_s20 + $0x8] sm:$0xff] }
  0xdc   : > { %v867_v23 = vpop.f32.mrf.mxu0  ;;  %v531_v42 = vadd.f32 %v530_v38, %v529_v34  ;;  %v540_v17 = vsel %vm528_vm4, %v524_v4, 0.0  ;;  %v542_v25 = vsel %vm528_vm4, %v526_v16, 0.0  ;;  %v837_v34 = vld [vmem:[%s1048_s4] ss:$0 sm:$0xff] }
  0xdd   : > { %v474_v31 = vadd.f32 %v867_v23, %v819_v18  ;;  %v513_v35 = vmax.f32 %v453_v26, 0.0  ;;  %v545_v52 = vsel %vm528_vm4, %v515_v39, 0.0  ;;  %v525_v19 = vmax.f32 %v501_v6, 0.0 }
  0xde   : > { %v465_v27 = vpop.f32.mrf.mxu0  ;;  %v527_v23 = vmax.f32 %v509_v9, 0.0 }
  0xdf   : > { %v466_v30 = vadd.f32 %v819_v18, %v465_v27  ;;  %v518_v43 = vmax.f32 %v474_v31, 0.0  ;;  %v544_v46 = vsel %vm528_vm4, %v513_v35, 0.0  ;;  %v555_v26 = vsel %vm528_vm4, %v525_v19, 0.0 }
  0xe0   : > { %v868_v32 = vpop.f32.mrf.mxu0  ;;  %v546_v56 = vadd.f32 %v545_v52, %v544_v46  ;;  %v557_v29 = vsel %vm528_vm4, %v527_v23, 0.0 }
  0xe1   : > { %v516_v36 = vmax.f32 %v466_v30, 0.0  ;;  %v477_v47 = vadd.f32 %v868_v32, %v819_v18  ;;  %v534_v57 = vsel %vm528_vm4, %v518_v43, 0.0 }
  0xe2   : > { %v468_v37 = vpop.f32.mrf.mxu0 }
  0xe3   : > { %v532_v40 = vsel %vm528_vm4, %v516_v36, 0.0  ;;  %v469_v41 = vadd.f32 %v819_v18, %v468_v37  ;;  %v519_v60 = vmax.f32 %v477_v47, 0.0 }
  0xe4   : > { %v871_v44 = vpop.f32.mrf.mxu0  ;;  %v533_v50 = vadd.f32 %v532_v40, %v531_v42  ;;  %v649_v42 = vlaneseq }
  0xe5   : > { %v517_v48 = vmax.f32 %v469_v41, 0.0  ;;  %v490_v49 = vadd.f32 %v871_v44, %v819_v18  ;;  %v549_v10 = vsel %vm528_vm4, %v519_v60, 0.0  ;;  %v931_v41 = vmov 0  }
  0xe6   : > { %v481_v51 = vpop.f32.mrf.mxu0  ;;  %v535_v2 = vadd.f32 %v534_v57, %v533_v50  ;;  %899 = vset.pattern.permute.xlu0 %v931_v41  ;;  %900 = vset.pattern.permute.xlu1 %v931_v41  ;;  %v650_v43 = vand.u32 127, %v649_v42 }
  0xe7   : > { %v547_v53 = vsel %vm528_vm4, %v517_v48, 0.0  ;;  %v482_v55 = vadd.f32 %v819_v18, %v481_v51  ;;  %v522_v61 = vmax.f32 %v490_v49, 0.0 }
  0xe8   : > { %v872_v58 = vpop.f32.mrf.mxu0  ;;  %v548_v0 = vadd.f32 %v547_v53, %v546_v56 }
  0xe9   : > { %v520_v62 = vmax.f32 %v482_v55, 0.0  ;;  %v493_v63 = vadd.f32 %v872_v58, %v819_v18  ;;  %v538_v11 = vsel %vm528_vm4, %v522_v61, 0.0  ;;  %v686_v58 = vld [vmem:[%s301_s20] sm:$0xff] }
  0xea   : > { %v484_v3 = vpop.f32.mrf.mxu0  ;;  %v550_v15 = vadd.f32 %v549_v10, %v548_v0 }
  0xeb   : > { %v536_v5 = vsel %vm528_vm4, %v520_v62, 0.0  ;;  %v485_v7 = vadd.f32 %v819_v18, %v484_v3  ;;  %v523_v12 = vmax.f32 %v493_v63, 0.0 }
  0xec   : > { %v537_v8 = vadd.f32 %v536_v5, %v535_v2 }
  0xed   : > { %v521_v13 = vmax.f32 %v485_v7, 0.0  ;;  %v553_v24 = vsel %vm528_vm4, %v523_v12, 0.0 }
  0xee   : > { %v539_v14 = vadd.f32 %v538_v11, %v537_v8 }
  0xef   : > { %v551_v20 = vsel %vm528_vm4, %v521_v13, 0.0 }
  0xf0   : > { %v541_v21 = vadd.f32 %v540_v17, %v539_v14  ;;  %v552_v22 = vadd.f32 %v551_v20, %v550_v15 }
  0xf2   : > { %v554_v18 = vadd.f32 %v553_v24, %v552_v22  ;;  %v543_v27 = vadd.f32 %v542_v25, %v541_v21 }
  0xf4   : > { %v556_v28 = vadd.f32 %v555_v26, %v554_v18  ;;  %v559_v31 = vmul.f32 0.125, %v543_v27 }
  0xf6   : > { %v558_v30 = vadd.f32 %v557_v29, %v556_v28 }
  0xf8   : > { %v560_v32 = vmul.f32 0.125, %v558_v30 }
  0xfa   : > { %v561_v33 = vpack.c.bf16 %v560_v32, %v559_v31 }
  0xfc   : > { %882 = vmatmul.mubr.msk.bf16.vlgmr.msra.gmra.mxu1 %vm528_vm4, %v561_v33 }
 0x1bc   : > { %v622_v35 = vpop.f32.mrf.mxu1 }
 0x1bd   : > { %v623_v36 = vadd.f32 %v837_v34, %v622_v35 }
 0x1be   : > { %v883_v37 = vpop.f32.mrf.mxu1 }
 0x1bf   : > { %629 = vmax.xlane.f32.xlu0 %v623_v36 }
 0x1c0   : > { %v625_v38 = vpop.f32.mrf.mxu1 }
 0x1c1   : > { %v626_v39 = vadd.f32 %v837_v34, %v625_v38 }
 0x1c2   : > { %v884_v40 = vpop.f32.mrf.mxu1 }
 0x1c3   : > { %631 = vmax.xlane.f32.xlu0 %v626_v39 }
 0x248   : > { %v630_v44 = vpop.xlane.xlu0 %629 }
 0x249   : > { %v633_v45 = vsub.f32 %v623_v36, %v630_v44  ;;  %vm651_vm5 = vcmp.eq.f32.partialorder %v623_v36, %v630_v44 }
 0x24a   : > { %v653_v46 = vsel %vm651_vm5, %v650_v43, 128 }
 0x24b   : > { %v635_v47 = vmul.f32 1.442695, %v633_v45  ;;  %v656_v48 = vshra.s32 %v653_v46, 16  ;;  %v655_v60 = vand.u32 65535, %v653_v46 }
 0x24c   : > { %v632_v49 = vpop.xlane.xlu0 %631 }
 0x24d   : > { %912 = vpow2.f32 %v635_v47  ;;  %v634_v50 = vsub.f32 %v626_v39, %v632_v49  ;;  %vm652_vm6 = vcmp.eq.f32.partialorder %v626_v39, %v632_v49  ;;  %v658_v51 = vcvt.s32.f32 %v656_v48 }
 0x24e   : > { %v654_v52 = vsel %vm652_vm6, %v650_v43, 128  ;;  %v657_v62 = vcvt.s32.f32 %v655_v60 }
 0x24f   : > { %v637_v53 = vmul.f32 1.442695, %v634_v50  ;;  %659 = vmin.xlane.f32.xlu0 %v658_v51  ;;  %v670_v54 = vshra.s32 %v654_v52, 16  ;;  %v669_v63 = vand.u32 65535, %v654_v52 }
 0x251   : > { %914 = vpow2.f32 %v637_v53  ;;  %v672_v55 = vcvt.s32.f32 %v670_v54  ;;  %v671_v2 = vcvt.s32.f32 %v669_v63 }
 0x253   : > { %673 = vmin.xlane.f32.xlu1 %v672_v55 }
 0x25a   : > { %v913_v56 = vpop.eup %912 }
 0x25b   : > { %639 = vadd.xlane.f32.xlu1 %v913_v56 }
 0x25e   : > { %v915_v57 = vpop.eup %914 }
 0x25f   : > { %641 = vadd.xlane.f32.xlu1 %v915_v57 }
 0x265   : > { %689 = vperm.xlu0 %899, %v686_v58  }
 0x270   : > { %692 = vperm.xlu1 %900, %v687_v59  }
 0x2d8   : > { %v660_v61 = vpop.xlane.xlu0 %659 }
 0x2d9   : > { %vm661_vm7 = vcmp.eq.f32.partialorder %v658_v51, %v660_v61  ;;  %v666_v16 = vcvt.f32.s32 %v660_v61 }
 0x2da   : > { %v662_v0 = vsel %vm661_vm7, %v657_v62, inf }
 0x2db   : > { %663 = vmin.xlane.f32.xlu1 %v662_v0  ;;  %v667_v19 = vshll.u32 %v666_v16, 16 }
 0x2dc   : > { %v674_v1 = vpop.xlane.xlu1 %673 }
 0x2dd   : > { %vm675_vm8 = vcmp.eq.f32.partialorder %v672_v55, %v674_v1  ;;  %v680_v20 = vcvt.f32.s32 %v674_v1 }
 0x2de   : > { %v676_v3 = vsel %vm675_vm8, %v671_v2, inf }
 0x2df   : > { %677 = vmin.xlane.f32.xlu0 %v676_v3  ;;  %v681_v24 = vshll.u32 %v680_v20, 16 }
 0x2e0   : > { %v690_v6 = vpop.permute.xlu0 %689 }
 0x2e1   : > { %vm694_vm9 = vcmp.eq.s32.totalorder %v650_v43, %v690_v6 }
 0x2e4   : > { %v640_v4 = vpop.xlane.xlu1 %639 }
 0x2e5   : > { %916 = vlog2.f32 %v640_v4 }
 0x2e8   : > { %v642_v5 = vpop.xlane.xlu1 %641 }
 0x2e9   : > { %918 = vlog2.f32 %v642_v5 }
 0x2ec   : > { %v693_v10 = vpop.permute.xlu1 %692 }
 0x2ed   : > { %vm695_vm10 = vcmp.eq.s32.totalorder %v650_v43, %v693_v10 }
 0x2f2   : > { %v917_v7 = vpop.eup %916 }
 0x2f3   : > { %v644_v8 = vmul.f32 0.6931472, %v917_v7 }
 0x2f5   : > { %v647_v9 = vsub.f32 %v633_v45, %v644_v8 }
 0x2f6   : > { %v919_v11 = vpop.eup %918 }
 0x2f7   : > { %v646_v12 = vmul.f32 0.6931472, %v919_v11  ;;  %v696_v13 = vsel %vm694_vm9, %v647_v9, 0.0 }
 0x2f8   : > { %698 = vadd.xlane.f32.xlu1 %v696_v13 }
 0x2f9   : > { %v648_v14 = vsub.f32 %v634_v50, %v646_v12 }
 0x2fb   : > { %v697_v15 = vsel %vm695_vm10, %v648_v14, 0.0 }
 0x2fc   : > { %700 = vadd.xlane.f32.xlu1 %v697_v15 }
 0x364   : > { %v664_v17 = vpop.xlane.xlu1 %663 }
 0x365   : > { %v665_v21 = vcvt.f32.s32 %v664_v17 }
 0x367   : > { %v668_v22 = vadd.s32 %v667_v19, %v665_v21 }
 0x368   : > { %v678_v23 = vpop.xlane.xlu0 %677 }
 0x369   : > { %684 = vst.msk [vmem:[%s306_s23] sm:$0xff] %vm683_vm11, %v668_v22  ;;  %v679_v18 = vcvt.f32.s32 %v678_v23 }
 0x36b   : > { %v682_v25 = vadd.s32 %v681_v24, %v679_v18 }
 0x36d   : > { %685 = vst.msk [vmem:[%s306_s23 + $0x8] sm:$0xff] %vm683_vm11, %v682_v25 }
 0x381   : > { %v699_v26 = vpop.xlane.xlu1 %698 }
 0x382   : > { %v702_v27 = vsub.f32 0.0, %v699_v26 }
 0x384   : > { %704 = vst.msk [vmem:[%s311_s27] sm:$0xff] %vm683_vm11, %v702_v27 }
 0x385   : > { %v701_v28 = vpop.xlane.xlu1 %700 }
 0x386   : > { %v703_v29 = vsub.f32 0.0, %v701_v28 }
 0x388   : > { %705 = vst.msk [vmem:[%s311_s27 + $0x8] sm:$0xff] %vm683_vm11, %v703_v29 }
 0x389 PF: > { %s18_s24 = sadd.s32 1, %s926_s24  }
 0x38a   : > { %p15_p4 = scmp.ge.s32.totalorder %s18_s24, 4  }
 0x38c   :  { %17 = sbr.rel (!%p15_p4) target bundleno = 1 (0x1), region = 89 }

</bundles_post_ra>
